<compile_context>
chip_gen: v7x
topology: tpu7x:2x2x1
jax: 0.10.0
libtpu: 0.0.40
codegen_flags: <defaults>
</compile_context>

<pallas_src>
import math

import numpy as np
import jax
import jax.numpy as jnp
from jax.experimental import pallas as pl
from jax.experimental.pallas import tpu as pltpu

HIDDEN = 32
NUM_EXPERTS = 2
NUM_HEADS = 4
LN_EPS = 1e-5
_INV_SQRT2 = 0.7071067811865476
_OUT_W = 128  # lane-dense packed output width


def _gelu(x):
    # exact (erf-based) GELU, matching torch.nn.GELU() default.
    # (tanh-approx would move work to the EUP but deviates ~1e-3; kept exact.)
    return 0.5 * x * (1.0 + jax.lax.erf(x * _INV_SQRT2))


# ---------------------------------------------------------------------------
# Parameter slab layout: everything lives in one [rows, 128] f32 array.
# Matrices are stacked along rows, each starting at lane 0; every bias gets
# its own row starting at lane 0 (no lane-offset sub-slices in the kernel).
# ---------------------------------------------------------------------------
def _build_layout(H):
    E, nh = NUM_EXPERTS, NUM_HEADS
    EH = E * H
    L = {}
    r = 0

    def add(name, nrows, ncols):
        nonlocal r
        L[name] = (r, r + nrows, 0, ncols)
        r += nrows

    add("enc_w", EH, EH)      # block-diag encoder Linear            [2H, 2H]
    add("lnmean", EH, EH)     # block-diag 1/H matrix (LN stats on MXU)
    add("wq", EH, EH)         # q of expert 0 replicated -> [q|q]    [2H, 2H]
    add("wk", EH, EH)         # block-diag K projection              [2H, 2H]
    add("wv", EH, EH)         # block-diag V projection              [2H, 2H]
    add("wo", EH, H)          # stacked [[Wo],[Wo]] (fold + out_proj)[2H,  H]
    add("f1_w", H, 2 * H)     # fusion Linear 1                      [H, 2H]
    add("f2_w", 2 * H, H)     # fusion Linear 2                      [2H, H]
    add("c1_w", EH, H)        # consistency Linear 1 (input = [enc0|enc1])
    add("c2_w", H, 1)         # consistency Linear 2                 [H, 1]
    add("seg0", EH, nh)       # lane -> head selector, expert 0
    add("seg1", EH, nh)       # lane -> head selector, expert 1
    add("exp0", nh, EH)       # head -> lanes expander, expert 0
    add("exp1", nh, EH)       # head -> lanes expander, expert 1
    add("avg0", nh, E)        # head-average pooling into column 0
    add("avg1", nh, E)        # head-average pooling into column 1

    # biases: one row each, starting at lane 0
    add("enc_b", 1, EH)
    add("ln_g", 1, EH)
    add("ln_b", 1, EH)
    add("bq", 1, EH)
    add("bk", 1, EH)
    add("bv", 1, EH)
    add("bo", 1, H)
    add("f1_b", 1, 2 * H)
    add("f2_b", 1, H)
    add("c1_b", 1, H)
    add("c2_b", 1, 1)

    rows = -(-r // 8) * 8     # pad rows to a multiple of 8
    width = 128               # lane-dense width (all blocks are <= 128 wide)
    return L, rows, width


_LAYOUT, _SLAB_ROWS, _SLAB_W = _build_layout(HIDDEN)


def pack_params(raw, hidden=HIDDEN):
    """Pack raw (torch-layout) parameters into a single [rows, 128] f32 slab."""
    H = hidden
    E, nh = NUM_EXPERTS, NUM_HEADS
    hd = H // nh
    EH = E * H
    L, rows, width = _build_layout(H)
    np32 = lambda a: np.asarray(a, np.float32)

    def blkdiag(W):
        out = np.zeros((EH, EH), np.float32)
        for e in range(E):
            out[e * H:(e + 1) * H, e * H:(e + 1) * H] = W
        return out

    enc_w = blkdiag(np32(raw["enc_w"]).T)                       # x @ W layout
    lnmean = blkdiag(np.full((H, H), 1.0 / H, np.float32))

    ipw = np32(raw["in_proj_w"])                                # [3H, H]
    Wq, Wk, Wv = ipw[0:H].T, ipw[H:2 * H].T, ipw[2 * H:3 * H].T
    ipb = np32(raw["in_proj_b"])
    bq, bk, bv = ipb[0:H], ipb[H:2 * H], ipb[2 * H:3 * H]

    wq = np.zeros((EH, EH), np.float32)
    wq[0:H, 0:H] = Wq            # expert-0 rows contribute ...
    wq[0:H, H:EH] = Wq           # ... to both output lane segments -> [q|q]
    wk = blkdiag(Wk)
    wv = blkdiag(Wv)
    wo = np.concatenate([np32(raw["out_proj_w"]).T] * E, axis=0)  # [2H, H]

    lanes = np.arange(EH)
    head_of = (lanes % H) // hd
    exp_of = lanes // H
    heads = np.arange(nh)[None, :]
    seg0 = ((exp_of[:, None] == 0) & (head_of[:, None] == heads)).astype(np.float32)
    seg1 = ((exp_of[:, None] == 1) & (head_of[:, None] == heads)).astype(np.float32)
    exp0, exp1 = seg0.T, seg1.T

    avg0 = np.zeros((nh, E), np.float32)
    avg0[:, 0] = 1.0 / nh
    avg1 = np.zeros((nh, E), np.float32)
    avg1[:, 1] = 1.0 / nh

    tile = lambda b: np.concatenate([np32(b)] * E)

    vals = {
        "enc_w": enc_w, "lnmean": lnmean,
        "wq": wq, "wk": wk, "wv": wv, "wo": wo,
        "f1_w": np32(raw["f1_w"]).T, "f2_w": np32(raw["f2_w"]).T,
        "c1_w": np32(raw["c1_w"]).T, "c2_w": np32(raw["c2_w"]).T,
        "seg0": seg0, "seg1": seg1, "exp0": exp0, "exp1": exp1,
        "avg0": avg0, "avg1": avg1,
        "enc_b": tile(raw["enc_b"]), "ln_g": tile(raw["ln_g"]),
        "ln_b": tile(raw["ln_b"]),
        "bq": tile(bq), "bk": tile(bk), "bv": tile(bv),
        "bo": np32(raw["out_proj_b"]),
        "f1_b": np32(raw["f1_b"]), "f2_b": np32(raw["f2_b"]),
        "c1_b": np32(raw["c1_b"]), "c2_b": np32(raw["c2_b"]),
    }

    slab = np.zeros((rows, width), np.float32)
    for name, (r0, r1, c0, c1) in L.items():
        slab[r0:r1, c0:c1] = np.asarray(vals[name], np.float32).reshape(r1 - r0, c1 - c0)
    return jnp.asarray(slab)


# ---------------------------------------------------------------------------
# Kernel (activations are lane-packed over experts: [TB, E*H])
# ---------------------------------------------------------------------------
def fusion_kernel(x_ref, ew_ref, p_ref, out_ref):
    TB = x_ref.shape[0]
    H = HIDDEN
    E = NUM_EXPERTS
    nh = NUM_HEADS
    f32 = jnp.float32

    def W(name):
        r0, r1, c0, c1 = _LAYOUT[name]
        return p_ref[r0:r1, c0:c1]

    x = x_ref[...]                                                   # [TB, 2H]

    # ---- encoder (both experts at once): Linear -> per-expert LN -> GELU ----
    h = jnp.dot(x, W("enc_w"), preferred_element_type=f32) + W("enc_b")
    mu = jnp.dot(h, W("lnmean"), preferred_element_type=f32)         # seg mean
    msq = jnp.dot(h * h, W("lnmean"), preferred_element_type=f32)    # seg E[h^2]
    var = jnp.maximum(msq - mu * mu, 0.0)                            # clamp >= 0
    hn = (h - mu) * jax.lax.rsqrt(var + LN_EPS)
    enc = _gelu(hn * W("ln_g") + W("ln_b"))                          # [TB, 2H]

    # ---- attention projections (lane-packed): q2=[q|q], k2=[k0|k1], v2=[v0|v1]
    q2 = jnp.dot(enc, W("wq"), preferred_element_type=f32) + W("bq")
    k2 = jnp.dot(enc, W("wk"), preferred_element_type=f32) + W("bk")
    v2 = jnp.dot(enc, W("wv"), preferred_element_type=f32) + W("bv")

    # ---- per-head scores via segment matrices, softmax over the 2 experts ----
    scale = 1.0 / math.sqrt(H // nh)
    qk = q2 * k2
    s0 = jnp.dot(qk, W("seg0"), preferred_element_type=f32) * scale  # [TB, nh]
    s1 = jnp.dot(qk, W("seg1"), preferred_element_type=f32) * scale
    m = jnp.maximum(s0, s1)
    p0 = jnp.exp(s0 - m)
    p1 = jnp.exp(s1 - m)
    inv = pl.reciprocal(p0 + p1, approx=True)                        # EUP slot
    p0 = p0 * inv
    p1 = p1 * inv

    # ---- expand probs to lanes, weight V, fold experts + out_proj in one push
    pfull = (jnp.dot(p0, W("exp0"), preferred_element_type=f32)
             + jnp.dot(p1, W("exp1"), preferred_element_type=f32))   # [TB, 2H]
    attn_out = jnp.dot(pfull * v2, W("wo"), preferred_element_type=f32) + W("bo")

    # ---- fusion MLP: Linear(H,2H) -> GELU -> Dropout(eval: id) -> Linear(2H,H)
    h1 = _gelu(jnp.dot(attn_out, W("f1_w"), preferred_element_type=f32) + W("f1_b"))
    fused = jnp.dot(h1, W("f2_w"), preferred_element_type=f32) + W("f2_b")   # [TB, H]

    # ---- consistency checker: input is exactly the lane-packed [enc0|enc1] ---
    c1 = _gelu(jnp.dot(enc, W("c1_w"), preferred_element_type=f32) + W("c1_b"))
    c2 = jnp.dot(c1, W("c2_w"), preferred_element_type=f32) + W("c2_b")      # [TB, 1]
    cons = pl.reciprocal(1.0 + jnp.exp(-c2), approx=True)                    # sigmoid

    # ---- head-averaged attention weights (MXU pooling), L1-normalized weights
    attn_w = (jnp.dot(p0, W("avg0"), preferred_element_type=f32)
              + jnp.dot(p1, W("avg1"), preferred_element_type=f32))          # [TB, E]
    w = ew_ref[...]
    denom = jnp.maximum(jnp.sum(jnp.abs(w), axis=-1, keepdims=True), 1e-12)
    norm_w = w / denom                                                       # [TB, E]

    # ---- single lane-packed output: [fused | cons | attn_w | norm_w | 0-pad] -
    pad = out_ref.shape[-1] - (H + 1 + 2 * E)
    out_ref[...] = jnp.concatenate(
        [fused, cons, attn_w, norm_w, jnp.zeros((TB, pad), f32)], axis=-1)


# ---------------------------------------------------------------------------
# Wrapper
# ---------------------------------------------------------------------------
def _pick_tb(B):
    """Row-tile size.

    Small batches: one step (v5e/v6e single-TC, per-step overhead is pure loss).
    B >= 16: split into >= 2 multiple-of-8 tiles (capped ~512) so both v7x
    TensorCores get work and input/output DMAs pipeline against compute.
    """
    if B <= 8:
        return B
    cap = min(512, B // 2)
    cap -= cap % 8
    for tb in range(cap, 7, -8):
        if B % tb == 0:
            return tb
    return B  # fall back to a single full-batch step


def expert_fusion_forward(expert_outputs, expert_weights, param_slab):
    # glue: replicate the PyTorch preprocessing of expert output dims,
    # then lane-pack the experts into a single [B, E*H] activation.
    proc = []
    for o in expert_outputs:
        o = jnp.asarray(o, jnp.float32)
        if o.ndim == 1:
            o = o[None, :]
        if o.ndim > 2:
            o = jnp.mean(o, axis=1)
        proc.append(o)
    E = len(proc)
    B, H = proc[0].shape
    assert E == NUM_EXPERTS, "kernel implements the default 2-expert fusion path"
    assert H == HIDDEN
    x = jnp.concatenate(proc, axis=-1)                              # [B, E*H]

    TB = _pick_tb(B)
    grid = (B // TB,)

    out = pl.pallas_call(
        fusion_kernel,
        grid=grid,
        in_specs=[
            pl.BlockSpec((TB, E * H), lambda i: (i, 0)),            # activations
            pl.BlockSpec((TB, E), lambda i: (i, 0)),                # expert weights
            pl.BlockSpec(param_slab.shape, lambda i: (0, 0)),       # param slab
        ],
        out_specs=pl.BlockSpec((TB, _OUT_W), lambda i: (i, 0)),
        out_shape=jax.ShapeDtypeStruct((B, _OUT_W), jnp.float32),
        compiler_params=pltpu.CompilerParams(
            dimension_semantics=("parallel",)),
    )(x, expert_weights.astype(jnp.float32), param_slab)

    fused = out[:, :H]
    cons = out[:, H:H + 1]
    attn_w = out[:, H + 1:H + 1 + E]
    norm_w = out[:, H + 1 + E:H + 1 + 2 * E]
    metadata = {
        "consistency_score": cons,
        "expert_influence": norm_w,
        "attention_weights": attn_w.reshape(B, 1, E),
    }
    return fused, metadata


# ---------------------------------------------------------------------------
# Parameter construction in torch layout (xavier_uniform_ weights, zero biases)
# ---------------------------------------------------------------------------
def make_params(key, hidden=HIDDEN):
    H = hidden
    ks = jax.random.split(key, 8)

    def xavier(k, out_f, in_f):
        bound = math.sqrt(6.0 / (in_f + out_f))
        return jax.random.uniform(k, (out_f, in_f), jnp.float32, -bound, bound)

    z = lambda *s: jnp.zeros(s, jnp.float32)
    return dict(
        enc_w=xavier(ks[0], H, H), enc_b=z(H),
        ln_g=jnp.ones((H,), jnp.float32), ln_b=z(H),
        in_proj_w=xavier(ks[1], 3 * H, H), in_proj_b=z(3 * H),
        out_proj_w=xavier(ks[2], H, H), out_proj_b=z(H),
        f1_w=xavier(ks[3], 2 * H, H), f1_b=z(2 * H),
        f2_w=xavier(ks[4], H, 2 * H), f2_b=z(H),
        c1_w=xavier(ks[5], H, 2 * H), c1_b=z(H),
        c2_w=xavier(ks[6], 1, H), c2_b=z(1),
    )


# TODO(synk): resolve_conflicts() (a separate helper, not part of forward) and
# the single-expert fallback branch are not implemented in the kernel.

if __name__ == "__main__":
    key = jax.random.PRNGKey(0)
    kp, k0, k1, kw = jax.random.split(key, 4)
    B = 8

    raw_params = make_params(kp)
    slab = pack_params(raw_params)

    expert_outputs = [
        jax.random.normal(k0, (B, HIDDEN), jnp.float32),
        jax.random.normal(k1, (B, HIDDEN), jnp.float32),
    ]
    expert_weights = jax.random.uniform(kw, (B, NUM_EXPERTS), jnp.float32)

    fused, meta = expert_fusion_forward(expert_outputs, expert_weights, slab)
    jax.block_until_ready((fused, meta))

    assert fused.shape == (B, HIDDEN)
    assert meta["consistency_score"].shape == (B, 1)
    assert meta["expert_influence"].shape == (B, NUM_EXPERTS)
    assert meta["attention_weights"].shape == (B, 1, NUM_EXPERTS)
    assert bool(jnp.all(jnp.isfinite(fused)))
    assert bool(jnp.all(jnp.isfinite(meta["consistency_score"])))
    print("KERNEL_OK")
</pallas_src>

<mosaic_0001>
module attributes {stable_mosaic.version = 11 : i64} {
  func.func @fusion_kernel(%arg0: i32, %arg1: memref<8x64xf32, #tpu.memory_space<vmem>>, %arg2: memref<8x2xf32, #tpu.memory_space<vmem>>, %arg3: memref<736x128xf32, #tpu.memory_space<vmem>>, %arg4: memref<8x128xf32, #tpu.memory_space<vmem>>) attributes {dimension_semantics = [#tpu.dimension_semantics<parallel>], iteration_bounds = array<i64: 1>, scalar_prefetch = 0 : i64, scratch_operands = 0 : i64, tpu.core_type = #tpu.core_type<tc>, window_params = [{transform_indices = @transform_0, window_bounds = array<i64: 8, 64>}, {transform_indices = @transform_1, window_bounds = array<i64: 8, 2>}, {pipeline_mode = #tpu.pipeline_mode<synchronous>, transform_indices = @transform_2, window_bounds = array<i64: 736, 128>}, {transform_indices = @transform_3, window_bounds = array<i64: 8, 128>}]} {
    %c0 = arith.constant 0 : index
    %c0_0 = arith.constant 0 : index
    %0 = vector.load %arg1[%c0, %c0_0] : memref<8x64xf32, #tpu.memory_space<vmem>>, vector<8x64xf32>
    %c0_1 = arith.constant 0 : index
    %c0_2 = arith.constant 0 : index
    %1 = vector.load %arg3[%c0_1, %c0_2] : memref<736x128xf32, #tpu.memory_space<vmem>>, vector<64x64xf32>
    %cst = arith.constant dense<0.000000e+00> : vector<8x64xf32>
    %2 = tpu.matmul %0, %1, %cst {dimension_numbers = #tpu.dot_dimension_numbers<[1], [0], [0], [1], [0, 0, 1, 1], [], []>} : vector<8x64xf32>, vector<64x64xf32>, vector<8x64xf32> -> vector<8x64xf32>
    %c720 = arith.constant 720 : index
    %c0_3 = arith.constant 0 : index
    %3 = vector.load %arg3[%c720, %c0_3] : memref<736x128xf32, #tpu.memory_space<vmem>>, vector<1x64xf32>
    %4 = vector.broadcast %3 : vector<1x64xf32> to vector<8x64xf32>
    %5 = arith.addf %2, %4 : vector<8x64xf32>
    %c64 = arith.constant 64 : index
    %c0_4 = arith.constant 0 : index
    %6 = vector.load %arg3[%c64, %c0_4] : memref<736x128xf32, #tpu.memory_space<vmem>>, vector<64x64xf32>
    %cst_5 = arith.constant dense<0.000000e+00> : vector<8x64xf32>
    %7 = tpu.matmul %5, %6, %cst_5 {dimension_numbers = #tpu.dot_dimension_numbers<[1], [0], [0], [1], [0, 0, 1, 1], [], []>} : vector<8x64xf32>, vector<64x64xf32>, vector<8x64xf32> -> vector<8x64xf32>
    %8 = arith.mulf %5, %5 : vector<8x64xf32>
    %c64_6 = arith.constant 64 : index
    %c0_7 = arith.constant 0 : index
    %9 = vector.load %arg3[%c64_6, %c0_7] : memref<736x128xf32, #tpu.memory_space<vmem>>, vector<64x64xf32>
    %cst_8 = arith.constant dense<0.000000e+00> : vector<8x64xf32>
    %10 = tpu.matmul %8, %9, %cst_8 {dimension_numbers = #tpu.dot_dimension_numbers<[1], [0], [0], [1], [0, 0, 1, 1], [], []>} : vector<8x64xf32>, vector<64x64xf32>, vector<8x64xf32> -> vector<8x64xf32>
    %11 = arith.mulf %7, %7 : vector<8x64xf32>
    %12 = arith.subf %10, %11 : vector<8x64xf32>
    %cst_9 = arith.constant 0.000000e+00 : f32
    %13 = vector.broadcast %cst_9 : f32 to vector<8x64xf32>
    %14 = arith.maximumf %12, %13 : vector<8x64xf32>
    %15 = arith.subf %5, %7 : vector<8x64xf32>
    %cst_10 = arith.constant 9.99999974E-6 : f32
    %16 = vector.broadcast %cst_10 : f32 to vector<8x64xf32>
    %17 = arith.addf %14, %16 : vector<8x64xf32>
    %18 = math.rsqrt %17 : vector<8x64xf32>
    %19 = arith.mulf %15, %18 : vector<8x64xf32>
    %c721 = arith.constant 721 : index
    %c0_11 = arith.constant 0 : index
    %20 = vector.load %arg3[%c721, %c0_11] : memref<736x128xf32, #tpu.memory_space<vmem>>, vector<1x64xf32>
    %21 = vector.broadcast %20 : vector<1x64xf32> to vector<8x64xf32>
    %22 = arith.mulf %19, %21 : vector<8x64xf32>
    %c722 = arith.constant 722 : index
    %c0_12 = arith.constant 0 : index
    %23 = vector.load %arg3[%c722, %c0_12] : memref<736x128xf32, #tpu.memory_space<vmem>>, vector<1x64xf32>
    %24 = vector.broadcast %23 : vector<1x64xf32> to vector<8x64xf32>
    %25 = arith.addf %22, %24 : vector<8x64xf32>
    %cst_13 = arith.constant 5.000000e-01 : f32
    %26 = vector.broadcast %cst_13 : f32 to vector<8x64xf32>
    %27 = arith.mulf %26, %25 : vector<8x64xf32>
    %cst_14 = arith.constant 0.707106769 : f32
    %28 = vector.broadcast %cst_14 : f32 to vector<8x64xf32>
    %29 = arith.mulf %25, %28 : vector<8x64xf32>
    %30 = math.erf %29 : vector<8x64xf32>
    %cst_15 = arith.constant 1.000000e+00 : f32
    %31 = vector.broadcast %cst_15 : f32 to vector<8x64xf32>
    %32 = arith.addf %31, %30 : vector<8x64xf32>
    %33 = arith.mulf %27, %32 : vector<8x64xf32>
    %c128 = arith.constant 128 : index
    %c0_16 = arith.constant 0 : index
    %34 = vector.load %arg3[%c128, %c0_16] : memref<736x128xf32, #tpu.memory_space<vmem>>, vector<64x64xf32>
    %cst_17 = arith.constant dense<0.000000e+00> : vector<8x64xf32>
    %35 = tpu.matmul %33, %34, %cst_17 {dimension_numbers = #tpu.dot_dimension_numbers<[1], [0], [0], [1], [0, 0, 1, 1], [], []>} : vector<8x64xf32>, vector<64x64xf32>, vector<8x64xf32> -> vector<8x64xf32>
    %c723 = arith.constant 723 : index
    %c0_18 = arith.constant 0 : index
    %36 = vector.load %arg3[%c723, %c0_18] : memref<736x128xf32, #tpu.memory_space<vmem>>, vector<1x64xf32>
    %37 = vector.broadcast %36 : vector<1x64xf32> to vector<8x64xf32>
    %38 = arith.addf %35, %37 : vector<8x64xf32>
    %c192 = arith.constant 192 : index
    %c0_19 = arith.constant 0 : index
    %39 = vector.load %arg3[%c192, %c0_19] : memref<736x128xf32, #tpu.memory_space<vmem>>, vector<64x64xf32>
    %cst_20 = arith.constant dense<0.000000e+00> : vector<8x64xf32>
    %40 = tpu.matmul %33, %39, %cst_20 {dimension_numbers = #tpu.dot_dimension_numbers<[1], [0], [0], [1], [0, 0, 1, 1], [], []>} : vector<8x64xf32>, vector<64x64xf32>, vector<8x64xf32> -> vector<8x64xf32>
    %c724 = arith.constant 724 : index
    %c0_21 = arith.constant 0 : index
    %41 = vector.load %arg3[%c724, %c0_21] : memref<736x128xf32, #tpu.memory_space<vmem>>, vector<1x64xf32>
    %42 = vector.broadcast %41 : vector<1x64xf32> to vector<8x64xf32>
    %43 = arith.addf %40, %42 : vector<8x64xf32>
    %c256 = arith.constant 256 : index
    %c0_22 = arith.constant 0 : index
    %44 = vector.load %arg3[%c256, %c0_22] : memref<736x128xf32, #tpu.memory_space<vmem>>, vector<64x64xf32>
    %cst_23 = arith.constant dense<0.000000e+00> : vector<8x64xf32>
    %45 = tpu.matmul %33, %44, %cst_23 {dimension_numbers = #tpu.dot_dimension_numbers<[1], [0], [0], [1], [0, 0, 1, 1], [], []>} : vector<8x64xf32>, vector<64x64xf32>, vector<8x64xf32> -> vector<8x64xf32>
    %c725 = arith.constant 725 : index
    %c0_24 = arith.constant 0 : index
    %46 = vector.load %arg3[%c725, %c0_24] : memref<736x128xf32, #tpu.memory_space<vmem>>, vector<1x64xf32>
    %47 = vector.broadcast %46 : vector<1x64xf32> to vector<8x64xf32>
    %48 = arith.addf %45, %47 : vector<8x64xf32>
    %49 = arith.mulf %38, %43 : vector<8x64xf32>
    %c576 = arith.constant 576 : index
    %c0_25 = arith.constant 0 : index
    %50 = vector.load %arg3[%c576, %c0_25] : memref<736x128xf32, #tpu.memory_space<vmem>>, vector<64x4xf32>
    %cst_26 = arith.constant dense<0.000000e+00> : vector<8x4xf32>
    %51 = tpu.matmul %49, %50, %cst_26 {dimension_numbers = #tpu.dot_dimension_numbers<[1], [0], [0], [1], [0, 0, 1, 1], [], []>} : vector<8x64xf32>, vector<64x4xf32>, vector<8x4xf32> -> vector<8x4xf32>
    %cst_27 = arith.constant 0.353553385 : f32
    %52 = vector.broadcast %cst_27 : f32 to vector<8x4xf32>
    %53 = arith.mulf %51, %52 : vector<8x4xf32>
    %c640 = arith.constant 640 : index
    %c0_28 = arith.constant 0 : index
    %54 = vector.load %arg3[%c640, %c0_28] : memref<736x128xf32, #tpu.memory_space<vmem>>, vector<64x4xf32>
    %cst_29 = arith.constant dense<0.000000e+00> : vector<8x4xf32>
    %55 = tpu.matmul %49, %54, %cst_29 {dimension_numbers = #tpu.dot_dimension_numbers<[1], [0], [0], [1], [0, 0, 1, 1], [], []>} : vector<8x64xf32>, vector<64x4xf32>, vector<8x4xf32> -> vector<8x4xf32>
    %cst_30 = arith.constant 0.353553385 : f32
    %56 = vector.broadcast %cst_30 : f32 to vector<8x4xf32>
    %57 = arith.mulf %55, %56 : vector<8x4xf32>
    %58 = arith.maximumf %53, %57 : vector<8x4xf32>
    %59 = arith.subf %53, %58 : vector<8x4xf32>
    %60 = math.exp %59 : vector<8x4xf32>
    %61 = arith.subf %57, %58 : vector<8x4xf32>
    %62 = math.exp %61 : vector<8x4xf32>
    %63 = arith.addf %60, %62 : vector<8x4xf32>
    %64 = tpu.reciprocal %63 {approx = true} : vector<8x4xf32> -> vector<8x4xf32>
    %65 = arith.mulf %60, %64 : vector<8x4xf32>
    %66 = arith.mulf %62, %64 : vector<8x4xf32>
    %c704 = arith.constant 704 : index
    %c0_31 = arith.constant 0 : index
    %67 = vector.load %arg3[%c704, %c0_31] : memref<736x128xf32, #tpu.memory_space<vmem>>, vector<4x64xf32>
    %cst_32 = arith.constant dense<0.000000e+00> : vector<8x64xf32>
    %68 = tpu.matmul %65, %67, %cst_32 {dimension_numbers = #tpu.dot_dimension_numbers<[1], [0], [0], [1], [0, 0, 1, 1], [], []>} : vector<8x4xf32>, vector<4x64xf32>, vector<8x64xf32> -> vector<8x64xf32>
    %c708 = arith.constant 708 : index
    %c0_33 = arith.constant 0 : index
    %69 = vector.load %arg3[%c708, %c0_33] : memref<736x128xf32, #tpu.memory_space<vmem>>, vector<4x64xf32>
    %cst_34 = arith.constant dense<0.000000e+00> : vector<8x64xf32>
    %70 = tpu.matmul %66, %69, %cst_34 {dimension_numbers = #tpu.dot_dimension_numbers<[1], [0], [0], [1], [0, 0, 1, 1], [], []>} : vector<8x4xf32>, vector<4x64xf32>, vector<8x64xf32> -> vector<8x64xf32>
    %71 = arith.addf %68, %70 : vector<8x64xf32>
    %72 = arith.mulf %71, %48 : vector<8x64xf32>
    %c320 = arith.constant 320 : index
    %c0_35 = arith.constant 0 : index
    %73 = vector.load %arg3[%c320, %c0_35] : memref<736x128xf32, #tpu.memory_space<vmem>>, vector<64x32xf32>
    %cst_36 = arith.constant dense<0.000000e+00> : vector<8x32xf32>
    %74 = tpu.matmul %72, %73, %cst_36 {dimension_numbers = #tpu.dot_dimension_numbers<[1], [0], [0], [1], [0, 0, 1, 1], [], []>} : vector<8x64xf32>, vector<64x32xf32>, vector<8x32xf32> -> vector<8x32xf32>
    %c726 = arith.constant 726 : index
    %c0_37 = arith.constant 0 : index
    %75 = vector.load %arg3[%c726, %c0_37] : memref<736x128xf32, #tpu.memory_space<vmem>>, vector<1x32xf32>
    %76 = vector.broadcast %75 : vector<1x32xf32> to vector<8x32xf32>
    %77 = arith.addf %74, %76 : vector<8x32xf32>
    %c384 = arith.constant 384 : index
    %c0_38 = arith.constant 0 : index
    %78 = vector.load %arg3[%c384, %c0_38] : memref<736x128xf32, #tpu.memory_space<vmem>>, vector<32x64xf32>
    %cst_39 = arith.constant dense<0.000000e+00> : vector<8x64xf32>
    %79 = tpu.matmul %77, %78, %cst_39 {dimension_numbers = #tpu.dot_dimension_numbers<[1], [0], [0], [1], [0, 0, 1, 1], [], []>} : vector<8x32xf32>, vector<32x64xf32>, vector<8x64xf32> -> vector<8x64xf32>
    %c727 = arith.constant 727 : index
    %c0_40 = arith.constant 0 : index
    %80 = vector.load %arg3[%c727, %c0_40] : memref<736x128xf32, #tpu.memory_space<vmem>>, vector<1x64xf32>
    %81 = vector.broadcast %80 : vector<1x64xf32> to vector<8x64xf32>
    %82 = arith.addf %79, %81 : vector<8x64xf32>
    %cst_41 = arith.constant 5.000000e-01 : f32
    %83 = vector.broadcast %cst_41 : f32 to vector<8x64xf32>
    %84 = arith.mulf %83, %82 : vector<8x64xf32>
    %cst_42 = arith.constant 0.707106769 : f32
    %85 = vector.broadcast %cst_42 : f32 to vector<8x64xf32>
    %86 = arith.mulf %82, %85 : vector<8x64xf32>
    %87 = math.erf %86 : vector<8x64xf32>
    %cst_43 = arith.constant 1.000000e+00 : f32
    %88 = vector.broadcast %cst_43 : f32 to vector<8x64xf32>
    %89 = arith.addf %88, %87 : vector<8x64xf32>
    %90 = arith.mulf %84, %89 : vector<8x64xf32>
    %c416 = arith.constant 416 : index
    %c0_44 = arith.constant 0 : index
    %91 = vector.load %arg3[%c416, %c0_44] : memref<736x128xf32, #tpu.memory_space<vmem>>, vector<64x32xf32>
    %cst_45 = arith.constant dense<0.000000e+00> : vector<8x32xf32>
    %92 = tpu.matmul %90, %91, %cst_45 {dimension_numbers = #tpu.dot_dimension_numbers<[1], [0], [0], [1], [0, 0, 1, 1], [], []>} : vector<8x64xf32>, vector<64x32xf32>, vector<8x32xf32> -> vector<8x32xf32>
    %c728 = arith.constant 728 : index
    %c0_46 = arith.constant 0 : index
    %93 = vector.load %arg3[%c728, %c0_46] : memref<736x128xf32, #tpu.memory_space<vmem>>, vector<1x32xf32>
    %94 = vector.broadcast %93 : vector<1x32xf32> to vector<8x32xf32>
    %95 = arith.addf %92, %94 : vector<8x32xf32>
    %c480 = arith.constant 480 : index
    %c0_47 = arith.constant 0 : index
    %96 = vector.load %arg3[%c480, %c0_47] : memref<736x128xf32, #tpu.memory_space<vmem>>, vector<64x32xf32>
    %cst_48 = arith.constant dense<0.000000e+00> : vector<8x32xf32>
    %97 = tpu.matmul %33, %96, %cst_48 {dimension_numbers = #tpu.dot_dimension_numbers<[1], [0], [0], [1], [0, 0, 1, 1], [], []>} : vector<8x64xf32>, vector<64x32xf32>, vector<8x32xf32> -> vector<8x32xf32>
    %c729 = arith.constant 729 : index
    %c0_49 = arith.constant 0 : index
    %98 = vector.load %arg3[%c729, %c0_49] : memref<736x128xf32, #tpu.memory_space<vmem>>, vector<1x32xf32>
    %99 = vector.broadcast %98 : vector<1x32xf32> to vector<8x32xf32>
    %100 = arith.addf %97, %99 : vector<8x32xf32>
    %cst_50 = arith.constant 5.000000e-01 : f32
    %101 = vector.broadcast %cst_50 : f32 to vector<8x32xf32>
    %102 = arith.mulf %101, %100 : vector<8x32xf32>
    %cst_51 = arith.constant 0.707106769 : f32
    %103 = vector.broadcast %cst_51 : f32 to vector<8x32xf32>
    %104 = arith.mulf %100, %103 : vector<8x32xf32>
    %105 = math.erf %104 : vector<8x32xf32>
    %cst_52 = arith.constant 1.000000e+00 : f32
    %106 = vector.broadcast %cst_52 : f32 to vector<8x32xf32>
    %107 = arith.addf %106, %105 : vector<8x32xf32>
    %108 = arith.mulf %102, %107 : vector<8x32xf32>
    %c544 = arith.constant 544 : index
    %c0_53 = arith.constant 0 : index
    %109 = vector.load %arg3[%c544, %c0_53] : memref<736x128xf32, #tpu.memory_space<vmem>>, vector<32x1xf32>
    %cst_54 = arith.constant dense<0.000000e+00> : vector<8x1xf32>
    %110 = tpu.matmul %108, %109, %cst_54 {dimension_numbers = #tpu.dot_dimension_numbers<[1], [0], [0], [1], [0, 0, 1, 1], [], []>} : vector<8x32xf32>, vector<32x1xf32>, vector<8x1xf32> -> vector<8x1xf32>
    %c730 = arith.constant 730 : index
    %c0_55 = arith.constant 0 : index
    %111 = vector.load %arg3[%c730, %c0_55] : memref<736x128xf32, #tpu.memory_space<vmem>>, vector<1x1xf32>
    %112 = vector.broadcast %111 : vector<1x1xf32> to vector<8x1xf32>
    %113 = arith.addf %110, %112 : vector<8x1xf32>
    %cst_56 = arith.constant 0.000000e+00 : f32
    %114 = vector.broadcast %cst_56 : f32 to vector<8x1xf32>
    %115 = arith.subf %114, %113 : vector<8x1xf32>
    %116 = math.exp %115 : vector<8x1xf32>
    %cst_57 = arith.constant 1.000000e+00 : f32
    %117 = vector.broadcast %cst_57 : f32 to vector<8x1xf32>
    %118 = arith.addf %117, %116 : vector<8x1xf32>
    %119 = tpu.reciprocal %118 {approx = true} : vector<8x1xf32> -> vector<8x1xf32>
    %c712 = arith.constant 712 : index
    %c0_58 = arith.constant 0 : index
    %120 = vector.load %arg3[%c712, %c0_58] : memref<736x128xf32, #tpu.memory_space<vmem>>, vector<4x2xf32>
    %cst_59 = arith.constant dense<0.000000e+00> : vector<8x2xf32>
    %121 = tpu.matmul %65, %120, %cst_59 {dimension_numbers = #tpu.dot_dimension_numbers<[1], [0], [0], [1], [0, 0, 1, 1], [], []>} : vector<8x4xf32>, vector<4x2xf32>, vector<8x2xf32> -> vector<8x2xf32>
    %c716 = arith.constant 716 : index
    %c0_60 = arith.constant 0 : index
    %122 = vector.load %arg3[%c716, %c0_60] : memref<736x128xf32, #tpu.memory_space<vmem>>, vector<4x2xf32>
    %cst_61 = arith.constant dense<0.000000e+00> : vector<8x2xf32>
    %123 = tpu.matmul %66, %122, %cst_61 {dimension_numbers = #tpu.dot_dimension_numbers<[1], [0], [0], [1], [0, 0, 1, 1], [], []>} : vector<8x4xf32>, vector<4x2xf32>, vector<8x2xf32> -> vector<8x2xf32>
    %124 = arith.addf %121, %123 : vector<8x2xf32>
    %c0_62 = arith.constant 0 : index
    %c0_63 = arith.constant 0 : index
    %125 = vector.load %arg2[%c0_62, %c0_63] : memref<8x2xf32, #tpu.memory_space<vmem>>, vector<8x2xf32>
    %126 = math.absf %125 : vector<8x2xf32>
    %cst_64 = arith.constant dense<0.000000e+00> : vector<8xf32>
    %127 = vector.multi_reduction <add>, %126, %cst_64 [1] : vector<8x2xf32> to vector<8xf32>
    %128 = vector.shape_cast %127 : vector<8xf32> to vector<8x1xf32>
    %cst_65 = arith.constant 9.99999996E-13 : f32
    %129 = vector.broadcast %cst_65 : f32 to vector<8x1xf32>
    %130 = arith.maximumf %128, %129 : vector<8x1xf32>
    %131 = vector.broadcast %130 : vector<8x1xf32> to vector<8x2xf32>
    %132 = arith.divf %125, %131 : vector<8x2xf32>
    %cst_66 = arith.constant 0.000000e+00 : f32
    %133 = vector.broadcast %cst_66 : f32 to vector<8x91xf32>
    %134 = tpu.concatenate %95, %119, %124, %132, %133 in 1 : vector<8x32xf32>, vector<8x1xf32>, vector<8x2xf32>, vector<8x2xf32>, vector<8x91xf32> -> vector<8x128xf32>
    %c0_67 = arith.constant 0 : index
    %c0_68 = arith.constant 0 : index
    %135 = vector.load %arg4[%c0_67, %c0_68] : memref<8x128xf32, #tpu.memory_space<vmem>>, vector<8x128xf32>
    tpu.vector_store %arg4[%c0_67, %c0_68], %134 {strides = array<i32>} : memref<8x128xf32, #tpu.memory_space<vmem>>, vector<8x128xf32>,
    return
  }
  func.func @transform_0(%arg0: i32) -> (i32, i32) {
    %c0_i32 = arith.constant 0 : i32
    %c0_i32_0 = arith.constant 0 : i32
    return %arg0, %c0_i32 : i32, i32
  }
  func.func @transform_1(%arg0: i32) -> (i32, i32) {
    %c0_i32 = arith.constant 0 : i32
    %c0_i32_0 = arith.constant 0 : i32
    return %arg0, %c0_i32 : i32, i32
  }
  func.func @transform_2(%arg0: i32) -> (i32, i32) {
    %c0_i32 = arith.constant 0 : i32
    %c0_i32_0 = arith.constant 0 : i32
    %c0_i32_1 = arith.constant 0 : i32
    return %c0_i32, %c0_i32_0 : i32, i32
  }
  func.func @transform_3(%arg0: i32) -> (i32, i32) {
    %c0_i32 = arith.constant 0 : i32
    %c0_i32_0 = arith.constant 0 : i32
    return %arg0, %c0_i32 : i32, i32
  }
}

</mosaic_0001>

<bundles_post_ra>
// kernel: tpu_custom_call.1
= control target key start
LH: loop header
LB: loop body
LE: loop exit
PB: predicated region body
PF: predicated region fallthrough
CT: control target
= control target key end

     0   :  { %8 = vsyncpa [#allocation3], 0  ;;  %s2305_s0 = inlined_call_operand.vmem [shape: f32[8,64], index: 0, kind: input, shape index: {}]   ;;  %s2306_s1 = inlined_call_operand.vmem [shape: f32[8,2], index: 1, kind: input, shape index: {}]   ;;  %s2307_s2 = inlined_call_operand.hbm [shape: f32[736,128], index: 2, kind: input, shape index: {}]   ;;  %s2308_s3 = inlined_call_operand.hbm [shape: f32[8,128], index: 3, kind: output, shape index: {}]  }
   0x1   :  { %9 = vsyncpa [#allocation4], 0  ;;  %s2131_s12 = smov [#allocation2]   ;;  %s2083_s16 = scalar_lea.hbm %s2307_s2, 11776 }
   0x2   :  { %s19_s13 = sshll.u32 %s2131_s12, 4  ;;  %p2084_p0 = scmp.ne.s32.totalorder %s2307_s2, %s2083_s16  ;;  %s20_s13 = int_to_ptr.vmem [resolvable:$true] %s19_s13 }
   0x3   :  { %p2087_p1 = scmp.lt.u32.totalorder %s2083_s16, %s2307_s2 }
   0x5   :  { %p2089_p2 = pnand %p2087_p1, %p2084_p0 }
   0x7   :  { %2092 = shalt.err (!%p2089_p2)
}
   0x8   :  { %s2093_s21 = scalar_lea.vmem %s20_s13, 11776  ;;  %p2098_p4 = scmp.lt.s32.totalorder %s20_s13, %s20_s13 }
   0x9   :  { %p2094_p3 = scmp.ne.s32.totalorder %s20_s13, %s2093_s21  ;;  %p2099_p5 = scmp.lt.s32.totalorder %s2093_s21, %s2093_s21 }
   0xb   :  { %p2100_p6 = por %p2099_p5, %p2098_p4 }
   0xd   :  { %p2101_p7 = pnand %p2100_p6, %p2094_p3 }
   0xf   :  { %2104 = shalt.err (!%p2101_p7)
}
  0x10   :  { %s2132_s22 = smov 128   ;;  %s2133_s23 = smov 8  }
  0x11   :  { %25 = dma.hbm_to_vmem [thread:$0]  %s2307_s2, 11776, %s20_s13, [#allocation3], %s2132_s22, %s2132_s22, %s2133_s23  }
  0x12   :  { %2127 = dma.done.wait [#allocation3], 11776  }
  0x13   :  { %2128 = vsyncadd [#allocation3], 4294955520  ;;  %v2134_v0 = vmov 0.0|0.0   ;;  %vm2135_vm0 = vmmov 0   ;;  %v2136_v1 = vmov 0.0   ;;  %v30_v2 = vld [vmem:[#allocation2] sm:$0xff] }
  0x14   :  { %1905 = vmatprep.subr.bf16.mxu0 %v2134_v0  ;;  %1670 = vmatprep.mubr.msk.f32.mxu0 %vm2135_vm0, %v2136_v1  ;;  %v31_v3 = vld [vmem:[#allocation2 + $0x8] sm:$0xff]  ;;  %v32_v4 = vld [vmem:[#allocation2 + $0x10] sm:$0xff]  ;;  %v33_v6 = vld [vmem:[#allocation2 + $0x18] sm:$0xff]  ;;  %vm43_vm1 = vcmask 523264   ;;  %vm727_vm2 = vcmask 1043456   ;;  %vm723_vm3 = vcmask 31744  }
  0x15   :  { %1917 = vmatprep.subr.bf16.mxu1 %v2134_v0  ;;  %1689 = vmatprep.mubr.msk.f32.mxu1 %vm2135_vm0, %v2136_v1  ;;  %v1906_v5 = vpack.c.bf16 %v31_v3, %v30_v2  ;;  %v1909_v7 = vpack.c.bf16 %v33_v6, %v32_v4  ;;  %v117_v8 = vld [vmem:[#allocation2 + $0x40] sm:$0xff]  ;;  %v118_v9 = vld [vmem:[#allocation2 + $0x48] sm:$0xff]  ;;  %v119_v10 = vld [vmem:[#allocation2 + $0x50] sm:$0xff]  ;;  %vm973_vm4 = vcmask 261120   ;;  %vm1463_vm5 = vcmask 15360   ;;  %s2139_s29 = smov 32  }
  0x16   :  { %v34_v11 = vld [vmem:[#allocation2 + $0x20] sm:$0xff]  ;;  %v35_v12 = vld [vmem:[#allocation2 + $0x28] sm:$0xff]  ;;  %v1918_v13 = vpack.c.bf16 %v118_v9, %v117_v8  ;;  %v120_v14 = vld [vmem:[#allocation2 + $0x58] sm:$0xff]  ;;  %vm1483_vm6 = vcmask 269312   ;;  %vm1485_vm7 = vcmask 285696   ;;  %s2140_s30 = smov [#allocation5]  }
  0x17   :  { %1907 = vmatpush3.bf16.msra.mxu0 %v1906_v5  ;;  %v1921_v15 = vpack.c.bf16 %v120_v14, %v119_v10  ;;  %v1912_v16 = vpack.c.bf16 %v35_v12, %v34_v11  ;;  %v121_v17 = vld [vmem:[#allocation2 + $0x60] sm:$0xff]  ;;  %v122_v18 = vld [vmem:[#allocation2 + $0x68] sm:$0xff]  ;;  %v36_v19 = vld [vmem:[#allocation2 + $0x30] sm:$0xff]  ;;  %s1496_s4 = sshll.u32 %s2140_s30, 4  ;;  %vm1487_vm8 = vcmask 302080   ;;  %s1497_s4 = int_to_ptr.vmem [resolvable:$true] %s1496_s4 }
  0x18   :  { %1908 = vmatprep.subr.bf16.mxu0 %v2134_v0  ;;  %1919 = vmatpush3.bf16.msra.mxu1 %v1918_v13  ;;  %v37_v20 = vld [vmem:[#allocation2 + $0x38] sm:$0xff]  ;;  %v1924_v21 = vpack.c.bf16 %v122_v18, %v121_v17  ;;  %v29_v23 = vld [vmem:[%s2305_s0] sm:$0xff]  ;;  %v123_v24 = vld [vmem:[#allocation2 + $0x70] sm:$0xff]  ;;  %s2137_s0 = smov 33   ;;  %s2105_s5 = scalar_lea.vmem %s1497_s4, 128 }
  0x19   :  { %1920 = vmatprep.subr.bf16.mxu1 %v2134_v0  ;;  %v1915_v22 = vpack.c.bf16 %v37_v20, %v36_v19  ;;  %v124_v25 = vld [vmem:[#allocation2 + $0x78] sm:$0xff]  ;;  %v1505_v27 = vld [vmem:[#allocation2 + $0x2d0] ss:$0 sm:$0xff]  ;;  %v296_v32 = vld [vmem:[#allocation2 + $0x80] sm:$0xff]  ;;  %p2106_p8 = scmp.ne.s32.totalorder %s1497_s4, %s2105_s5  ;;  %p2110_p9 = scmp.lt.s32.totalorder %s1497_s4, %s1497_s4 }
  0x1a   :  { %v1927_v26 = vpack.c.bf16 %v124_v25, %v123_v24  ;;  %v297_v33 = vld [vmem:[#allocation2 + $0x88] sm:$0xff]  ;;  %v382_v34 = vld [vmem:[#allocation2 + $0xc0] sm:$0xff]  ;;  %v298_v37 = vld [vmem:[#allocation2 + $0x90] sm:$0xff]  ;;  %p2111_p10 = scmp.lt.s32.totalorder %s2105_s5, %s2105_s5 }
  0x1b   :  { %1910 = vmatpush3.bf16.msra.mxu0 %v1909_v7  ;;  %v1942_v35 = vpack.c.bf16 %v297_v33, %v296_v32  ;;  %v383_v36 = vld [vmem:[#allocation2 + $0xc8] sm:$0xff]  ;;  %v299_v38 = vld [vmem:[#allocation2 + $0x98] sm:$0xff]  ;;  %v384_v40 = vld [vmem:[#allocation2 + $0xd0] sm:$0xff] }
  0x1c   :  { %1911 = vmatprep.subr.bf16.mxu0 %v2134_v0  ;;  %1922 = vmatpush3.bf16.msra.mxu1 %v1921_v15  ;;  %v1954_v39 = vpack.c.bf16 %v383_v36, %v382_v34  ;;  %v385_v41 = vld [vmem:[#allocation2 + $0xd8] sm:$0xff]  ;;  %v1945_v42 = vpack.c.bf16 %v299_v38, %v298_v37  ;;  %v300_v44 = vld [vmem:[#allocation2 + $0xa0] sm:$0xff]  ;;  %v301_v45 = vld [vmem:[#allocation2 + $0xa8] sm:$0xff]  ;;  %p2112_p11 = por %p2111_p10, %p2110_p9 }
  0x1d   :  { %1923 = vmatprep.subr.bf16.mxu1 %v2134_v0  ;;  %v1957_v43 = vpack.c.bf16 %v385_v41, %v384_v40  ;;  %v386_v46 = vld [vmem:[#allocation2 + $0xe0] sm:$0xff]  ;;  %v387_v47 = vld [vmem:[#allocation2 + $0xe8] sm:$0xff]  ;;  %v1948_v48 = vpack.c.bf16 %v301_v45, %v300_v44  ;;  %v302_v50 = vld [vmem:[#allocation2 + $0xb0] sm:$0xff] }
  0x1e   :  { %v1960_v49 = vpack.c.bf16 %v387_v47, %v386_v46  ;;  %v303_v51 = vld [vmem:[#allocation2 + $0xb8] sm:$0xff]  ;;  %v388_v52 = vld [vmem:[#allocation2 + $0xf0] sm:$0xff]  ;;  %v465_v10 = vld [vmem:[#allocation2 + $0x100] sm:$0xff]  ;;  %p2113_p12 = pnand %p2112_p11, %p2106_p8 }
  0x1f   :  { %1913 = vmatpush3.bf16.msra.mxu0 %v1912_v16  ;;  %v389_v53 = vld [vmem:[#allocation2 + $0xf8] sm:$0xff]  ;;  %v1951_v54 = vpack.c.bf16 %v303_v51, %v302_v50  ;;  %v1509_v4 = vld [vmem:[#allocation2 + $0x2d1] ss:$0 sm:$0xff]  ;;  %v1510_v6 = vld [vmem:[#allocation2 + $0x2d2] ss:$0 sm:$0xff] }
  0x20   :  { %1914 = vmatprep.subr.bf16.mxu0 %v2134_v0  ;;  %1925 = vmatpush3.bf16.msra.mxu1 %v1924_v21  ;;  %v1963_v55 = vpack.c.bf16 %v389_v53, %v388_v52  ;;  %v466_v11 = vld [vmem:[#allocation2 + $0x108] sm:$0xff]  ;;  %v467_v19 = vld [vmem:[#allocation2 + $0x110] sm:$0xff]  ;;  %v468_v20 = vld [vmem:[#allocation2 + $0x118] sm:$0xff] }
  0x21   :  { %1926 = vmatprep.subr.bf16.mxu1 %v2134_v0  ;;  %v550_v14 = vld [vmem:[#allocation2 + $0x248] sm:$0xff]  ;;  %v1966_v17 = vpack.c.bf16 %v466_v11, %v465_v10  ;;  %v1969_v24 = vpack.c.bf16 %v468_v20, %v467_v19  ;;  %v469_v25 = vld [vmem:[#allocation2 + $0x120] sm:$0xff]  ;;  %v472_v32 = vld [vmem:[#allocation2 + $0x138] sm:$0xff] }
  0x22   :  { %v632_v36 = vld [vmem:[#allocation2 + $0x288] sm:$0xff]  ;;  %v633_v38 = vld [vmem:[#allocation2 + $0x290] sm:$0xff]  ;;  %v635_v41 = vld [vmem:[#allocation2 + $0x2a0] sm:$0xff] }
  0x23   :  { %1916 = vmatpush3.bf16.msra.mxu0 %v1915_v22  ;;  %v551_v22 = vld [vmem:[#allocation2 + $0x250] sm:$0xff]  ;;  %v556_v45 = vld [vmem:[#allocation2 + $0x278] sm:$0xff] }
  0x24   :  { %1929 = vmatprep.subr.bf16.mxu0 %v2134_v0  ;;  %1928 = vmatpush3.bf16.msra.mxu1 %v1927_v26  ;;  %v555_v44 = vld [vmem:[#allocation2 + $0x270] sm:$0xff]  ;;  %v885_v10 = vld [vmem:[#allocation2 + $0x178] sm:$0xff] }
  0x25   :  { %1941 = vmatprep.subr.bf16.mxu1 %v2134_v0  ;;  %v637_v46 = vld [vmem:[#allocation2 + $0x2b0] sm:$0xff]  ;;  %v1987_v47 = vpack.c.bf16 %v556_v45, %v555_v44  ;;  %v1142_v45 = vld [vmem:[#allocation2 + $0x200] sm:$0xff] }
  0x26   :  { %1671 = vmatmul.mubr.msk.f32.vlgmr.msra.gmra.mrb[0].mxu0 %vm43_vm1, %v29_v23  ;;  %v552_v23 = vld [vmem:[#allocation2 + $0x258] sm:$0xff]  ;;  %v1511_v50 = vld [vmem:[#allocation2 + $0x2d3] ss:$0 sm:$0xff]  ;;  %v1513_v51 = vld [vmem:[#allocation2 + $0x2d4] ss:$0 sm:$0xff] }
  0x27   :  { %1931 = vmatpush3.bf16.msra.mxu0 %v1918_v13  ;;  %1708 = vmatprep.mubr.msk.f32.mxu0 %vm2135_vm0, %v2136_v1  ;;  %v549_v13 = vld [vmem:[#allocation2 + $0x240] sm:$0xff] }
  0x28   :  { %1932 = vmatprep.subr.bf16.mxu0 %v2134_v0 }
  0x2b   :  { %1934 = vmatpush3.bf16.msra.mxu0 %v1921_v15 }
  0x2c   :  { %1935 = vmatprep.subr.bf16.mxu0 %v2134_v0 }
  0x2f   :  { %1937 = vmatpush3.bf16.msra.mxu0 %v1924_v21  ;;  %v1978_v21 = vpack.c.bf16 %v550_v14, %v549_v13 }
  0x30   :  { %1938 = vmatprep.subr.bf16.mxu0 %v2134_v0 }
  0x33   :  { %1940 = vmatpush3.bf16.msra.mxu0 %v1927_v26  ;;  %v470_v26 = vld [vmem:[#allocation2 + $0x128] sm:$0xff] }
  0x34   :  { %1953 = vmatprep.subr.bf16.mxu0 %v2134_v0 }
  0xf9   :  { %v113_v28 = vpop.f32.mrb[0].mxu0 }
  0xfa   :  { %v114_v29 = vadd.f32 %v1505_v27, %v113_v28  ;;  %v1672_v30 = vpop.f32.mrb[1].mxu0  ;;  %v1981_v27 = vpack.c.bf16 %v552_v23, %v551_v22  ;;  %v553_v28 = vld [vmem:[#allocation2 + $0x260] sm:$0xff] }
  0xfb   :  { %v1972_v30 = vpack.c.bf16 %v470_v26, %v469_v25 }
  0xfc   :  { %v198_v31 = vmul.f32 %v114_v29, %v114_v29  ;;  %1690 = vmatmul.mubr.msk.f32.vlgmr.msra.gmra.mrb[0].mxu1 %vm43_vm1, %v114_v29 }
  0xfd   :  { %1727 = vmatprep.mubr.msk.f32.mxu1 %vm2135_vm0, %v2136_v1  ;;  %1943 = vmatpush3.bf16.msra.mxu1 %v1942_v35  ;;  %v631_v35 = vld [vmem:[#allocation2 + $0x280] sm:$0xff] }
  0xfe   :  { %1709 = vmatmul.mubr.msk.f32.vlgmr.msra.gmra.mrb[2].mxu0 %vm43_vm1, %v198_v31  ;;  %1944 = vmatprep.subr.bf16.mxu1 %v2134_v0  ;;  %v471_v31 = vld [vmem:[#allocation2 + $0x130] sm:$0xff]  ;;  %v1990_v37 = vpack.c.bf16 %v632_v36, %v631_v35  ;;  %v1138_v35 = vld [vmem:[#allocation2 + $0x1e0] sm:$0xff]  ;;  %v1139_v36 = vld [vmem:[#allocation2 + $0x1e8] sm:$0xff] }
  0xff   :  { %1746 = vmatprep.mubr.msk.f32.mxu0 %vm2135_vm0, %v2136_v1  ;;  %1955 = vmatpush3.bf16.msra.mxu0 %v1954_v39  ;;  %v1975_v34 = vpack.c.bf16 %v472_v32, %v471_v31  ;;  %v634_v39 = vld [vmem:[#allocation2 + $0x298] sm:$0xff]  ;;  %v964_v31 = vld [vmem:[#allocation2 + $0x180] sm:$0xff]  ;;  %v965_v32 = vld [vmem:[#allocation2 + $0x188] sm:$0xff] }
 0x100   :  { %1956 = vmatprep.subr.bf16.mxu0 %v2134_v0  ;;  %v1993_v40 = vpack.c.bf16 %v634_v39, %v633_v38  ;;  %v2032_v39 = vpack.c.bf16 %v1139_v36, %v1138_v35 }
 0x101   :  { %1946 = vmatpush3.bf16.msra.mxu1 %v1945_v42  ;;  %v636_v42 = vld [vmem:[#allocation2 + $0x2a8] sm:$0xff] }
 0x102   :  { %1947 = vmatprep.subr.bf16.mxu1 %v2134_v0 }
 0x103   :  { %1958 = vmatpush3.bf16.msra.mxu0 %v1957_v43  ;;  %v1996_v43 = vpack.c.bf16 %v636_v42, %v635_v41  ;;  %v1140_v42 = vld [vmem:[#allocation2 + $0x1f0] sm:$0xff] }
 0x104   :  { %1959 = vmatprep.subr.bf16.mxu0 %v2134_v0 }
 0x105   :  { %1949 = vmatpush3.bf16.msra.mxu1 %v1948_v48  ;;  %v638_v48 = vld [vmem:[#allocation2 + $0x2b8] sm:$0xff] }
 0x106   :  { %1950 = vmatprep.subr.bf16.mxu1 %v2134_v0 }
 0x107   :  { %1961 = vmatpush3.bf16.msra.mxu0 %v1960_v49  ;;  %v1999_v49 = vpack.c.bf16 %v638_v48, %v637_v46  ;;  %v1143_v46 = vld [vmem:[#allocation2 + $0x208] sm:$0xff]  ;;  %v1144_v48 = vld [vmem:[#allocation2 + $0x210] sm:$0xff] }
 0x108   :  { %1962 = vmatprep.subr.bf16.mxu0 %v2134_v0 }
 0x109   :  { %1952 = vmatpush3.bf16.msra.mxu1 %v1951_v54 }
 0x10a   :  { %1965 = vmatprep.subr.bf16.mxu1 %v2134_v0 }
 0x10b   :  { %1964 = vmatpush3.bf16.msra.mxu0 %v1963_v55 }
 0x10c   :  { %1977 = vmatprep.subr.bf16.mxu0 %v2134_v0 }
 0x1cf   :  { %v194_v56 = vpop.f32.mrb[0].mxu1 }
 0x1d0   :  { %v272_v57 = vmul.f32 %v194_v56, %v194_v56  ;;  %v1691_v58 = vpop.f32.mrb[1].mxu1  ;;  %v275_v2 = vsub.f32 %v114_v29, %v194_v56  ;;  %v554_v29 = vld [vmem:[#allocation2 + $0x268] sm:$0xff] }
 0x1d1   :  { %v268_v59 = vpop.f32.mrb[2].mxu0  ;;  %v1984_v33 = vpack.c.bf16 %v554_v29, %v553_v28  ;;  %v721_v29 = vld [vmem:[#allocation2 + $0x2c0] sm:$0xf] }
 0x1d2   :  { %v273_v60 = vsub.f32 %v268_v59, %v272_v57  ;;  %v1710_v61 = vpop.f32.mrb[3].mxu0 }
 0x1d3   :  { %v722_v61 = vld [vmem:[#allocation2 + $0x2c4] sm:$0xf] }
 0x1d4   :  { %v274_v62 = vmax.f32 %v273_v60, 0.0 }
 0x1d6   :  { %v276_v63 = vadd.f32 1e-05, %v274_v62  ;;  %v878_v62 = vld [vmem:[#allocation2 + $0x140] sm:$0xff] }
 0x1d8   :  { %2063 = vrsqrt.f32 %v276_v63  ;;  %v879_v63 = vld [vmem:[#allocation2 + $0x148] sm:$0xff] }
 0x1e2   :  { %v2064_v3 = vpop.eup %2063 }
 0x1e3   :  { %v278_v5 = vmul.f32 %v2064_v3, %v275_v2  ;;  %v880_v2 = vld [vmem:[#allocation2 + $0x150] sm:$0xff]  ;;  %v2002_v3 = vpack.c.bf16 %v879_v63, %v878_v62  ;;  %v1052_v63 = vld [vmem:[#allocation2 + $0x1a0] sm:$0xff] }
 0x1e5   :  { %v284_v7 = vmul.f32 %v1509_v4, %v278_v5  ;;  %v881_v4 = vld [vmem:[#allocation2 + $0x158] sm:$0xff] }
 0x1e6   :  { %v2005_v5 = vpack.c.bf16 %v881_v4, %v880_v2  ;;  %v1053_v2 = vld [vmem:[#allocation2 + $0x1a8] sm:$0xff]  ;;  %v1054_v4 = vld [vmem:[#allocation2 + $0x1b0] sm:$0xff] }
 0x1e7   :  { %v290_v8 = vadd.f32 %v1510_v6, %v284_v7  ;;  %v882_v6 = vld [vmem:[#allocation2 + $0x160] sm:$0xff]  ;;  %v883_v7 = vld [vmem:[#allocation2 + $0x168] sm:$0xff] }
 0x1e9   :  { %v292_v9 = vmul.f32 0.70710677, %v290_v8  ;;  %v291_v15 = vmul.f32 0.5, %v290_v8  ;;  %v2008_v8 = vpack.c.bf16 %v883_v7, %v882_v6  ;;  %v1056_v7 = vld [vmem:[#allocation2 + $0x1c0] sm:$0xff] }
 0x1eb   :  { %2065 = verf.f32 %v292_v9  ;;  %v884_v9 = vld [vmem:[#allocation2 + $0x170] sm:$0xff] }
 0x1ec   :  { %v2011_v11 = vpack.c.bf16 %v885_v10, %v884_v9  ;;  %v1058_v10 = vld [vmem:[#allocation2 + $0x1d0] sm:$0xff] }
 0x1f5   :  { %v2066_v12 = vpop.eup %2065 }
 0x1f6   :  { %v294_v16 = vadd.f32 1.0, %v2066_v12 }
 0x1f8   :  { %v2211_v18 = vmul.f32 %v294_v16, %v291_v15 }
 0x1fa   :  { %1728 = vmatmul.mubr.msk.f32.vlgmr.msra.gmra.mrb[2].mxu1 %vm43_vm1, %v2211_v18  ;;  %1747 = vmatmul.mubr.msk.f32.vlgmr.msra.gmra.mrb[4].mxu0 %vm43_vm1, %v2211_v18 }
 0x1fb   :  { %1967 = vmatpush3.bf16.msra.mxu1 %v1966_v17  ;;  %1765 = vmatprep.mubr.msk.f32.mxu1 %vm2135_vm0, %v2136_v1 }
 0x1fc   :  { %1968 = vmatprep.subr.bf16.mxu1 %v2134_v0  ;;  %1979 = vmatpush3.bf16.msra.mxu0 %v1978_v21 }
 0x1fd   :  { %1980 = vmatprep.subr.bf16.mxu0 %v2134_v0  ;;  %1784 = vmatprep.mubr.msk.f32.mxu0 %vm2135_vm0, %v2136_v1 }
 0x1ff   :  { %1970 = vmatpush3.bf16.msra.mxu1 %v1969_v24 }
 0x200   :  { %1971 = vmatprep.subr.bf16.mxu1 %v2134_v0  ;;  %1982 = vmatpush3.bf16.msra.mxu0 %v1981_v27 }
 0x201   :  { %1983 = vmatprep.subr.bf16.mxu0 %v2134_v0 }
 0x203   :  { %1973 = vmatpush3.bf16.msra.mxu1 %v1972_v30 }
 0x204   :  { %1974 = vmatprep.subr.bf16.mxu1 %v2134_v0  ;;  %1985 = vmatpush3.bf16.msra.mxu0 %v1984_v33  ;;  %v2014_v33 = vpack.c.bf16 %v965_v32, %v964_v31  ;;  %v1228_v32 = vld [vmem:[#allocation2 + $0x230] sm:$0xff] }
 0x205   :  { %1986 = vmatprep.subr.bf16.mxu0 %v2134_v0 }
 0x207   :  { %1976 = vmatpush3.bf16.msra.mxu1 %v1975_v34  ;;  %v1515_v34 = vld [vmem:[#allocation2 + $0x2d5] ss:$0 sm:$0xff] }
 0x208   :  { %1989 = vmatprep.subr.bf16.mxu1 %v2134_v0  ;;  %1988 = vmatpush3.bf16.msra.mxu0 %v1987_v47  ;;  %v2038_v47 = vpack.c.bf16 %v1143_v46, %v1142_v45  ;;  %v1531_v45 = vld [vmem:[#allocation2 + $0x2da] ss:$0 sm:$0xff] }
 0x209   :  { %1806 = vmatprep.subr.mxu0 %v2136_v1 }
 0x20a   :  { %1766 = vmatmul.mubr.msk.f32.vlgmr.msra.gmra.mrb[4].mxu1 %vm43_vm1, %v2211_v18 }
 0x20b   :  { %1991 = vmatpush3.bf16.msra.mxu1 %v1990_v37  ;;  %1803 = vmatprep.mubr.msk.f32.mxu1 %vm2135_vm0, %v2136_v1 }
 0x20c   :  { %1992 = vmatprep.subr.bf16.mxu1 %v2134_v0 }
 0x20f   :  { %1994 = vmatpush3.bf16.msra.mxu1 %v1993_v40 }
 0x210   :  { %1995 = vmatprep.subr.bf16.mxu1 %v2134_v0 }
 0x213   :  { %1997 = vmatpush3.bf16.msra.mxu1 %v1996_v43  ;;  %v1141_v43 = vld [vmem:[#allocation2 + $0x1f8] sm:$0xff] }
 0x214   :  { %1998 = vmatprep.subr.bf16.mxu1 %v2134_v0  ;;  %v2035_v44 = vpack.c.bf16 %v1141_v43, %v1140_v42 }
 0x217   :  { %2000 = vmatpush3.bf16.msra.mxu1 %v1999_v49  ;;  %v1145_v49 = vld [vmem:[#allocation2 + $0x218] sm:$0xff] }
 0x218   :  { %2001 = vmatprep.subr.bf16.mxu1 %v2134_v0 }
 0x2cd   :  { %v378_v52 = vpop.f32.mrb[2].mxu1  ;;  %v461_v53 = vpop.f32.mrb[4].mxu0 }
 0x2ce   :  { %v379_v54 = vadd.f32 %v1511_v50, %v378_v52  ;;  %v462_v55 = vadd.f32 %v1513_v51, %v461_v53  ;;  %v1729_v56 = vpop.f32.mrb[3].mxu1  ;;  %v1748_v57 = vpop.f32.mrb[5].mxu0  ;;  %v2041_v50 = vpack.c.bf16 %v1145_v49, %v1144_v48  ;;  %v1314_v51 = vld [vmem:[#allocation2 + $0x2cc] sm:$0xf]  ;;  %v1313_v52 = vld [vmem:[#allocation2 + $0x2c8] sm:$0xf] }
 0x2cf   :  { %v966_v53 = vld [vmem:[#allocation2 + $0x190] sm:$0xff] }
 0x2d0   :  { %v548_v58 = vmul.f32 %v462_v55, %v379_v54  ;;  %v967_v54 = vld [vmem:[#allocation2 + $0x198] sm:$0xff]  ;;  %v1523_v55 = vld [vmem:[#allocation2 + $0x2d6] ss:$0 sm:$0xff] }
 0x2d2   :  { %1785 = vmatmul.mubr.msk.f32.vlgmr.msra.gmra.mrb[6].mxu0 %vm43_vm1, %v548_v58  ;;  %1804 = vmatmul.mubr.msk.f32.vlgmr.msra.gmra.mrb[6].mxu1 %vm43_vm1, %v548_v58 }
 0x2d3   :  { %1808 = vmatprep.mubr.msk.f32.mxu0 %vm2135_vm0, %v2136_v1  ;;  %1832 = vmatprep.mubr.msk.f32.mxu1 %vm2135_vm0, %v2136_v1 }
 0x2d4   :  { %1807 = vmatpush3.msk.msra.mxu0 %vm727_vm2, %v722_v61  ;;  %2003 = vmatpush3.bf16.msra.mxu1 %v2002_v3  ;;  %v2020_v3 = vpack.c.bf16 %v1053_v2, %v1052_v63 }
 0x2d5   :  { %1811 = vmatprep.subr.mxu0 %v2136_v1  ;;  %2004 = vmatprep.subr.bf16.mxu1 %v2134_v0 }
 0x2d8   :  { %2006 = vmatpush3.bf16.msra.mxu1 %v2005_v5  ;;  %v1055_v5 = vld [vmem:[#allocation2 + $0x1b8] sm:$0xff] }
 0x2d9   :  { %2007 = vmatprep.subr.bf16.mxu1 %v2134_v0  ;;  %v2023_v6 = vpack.c.bf16 %v1055_v5, %v1054_v4 }
 0x2dc   :  { %2009 = vmatpush3.bf16.msra.mxu1 %v2008_v8  ;;  %v1057_v8 = vld [vmem:[#allocation2 + $0x1c8] sm:$0xff] }
 0x2dd   :  { %v544_v59 = vpop.f32.mrb[4].mxu1  ;;  %2010 = vmatprep.subr.bf16.mxu1 %v2134_v0  ;;  %v2026_v9 = vpack.c.bf16 %v1057_v8, %v1056_v7 }
 0x2de   :  { %v1767_v60 = vpop.f32.mrb[5].mxu1  ;;  %v545_v37 = vadd.f32 %v1515_v34, %v544_v59 }
 0x2e0   :  { %2012 = vmatpush3.bf16.msra.mxu1 %v2011_v11  ;;  %v1059_v11 = vld [vmem:[#allocation2 + $0x1d8] sm:$0xff] }
 0x2e1   :  { %2031 = vmatprep.subr.bf16.mxu1 %v2134_v0 }
 0x3a5   :  { %v626_v12 = vpop.f32.mrb[6].mxu0  ;;  %v705_v13 = vpop.f32.mrb[6].mxu1 }
 0x3a6   :  { %v630_v14 = vmul.f32 0.35355338, %v626_v12  ;;  %v709_v15 = vmul.f32 0.35355338, %v705_v13  ;;  %v1786_v16 = vpop.f32.mrb[7].mxu0  ;;  %v1805_v17 = vpop.f32.mrb[7].mxu1  ;;  %v2029_v12 = vpack.c.bf16 %v1059_v11, %v1058_v10 }
 0x3a7   :  { %v1461_v13 = vld [vmem:[%s2306_s1] sm:$0xff]  ;;  %v1529_v16 = vld [vmem:[#allocation2 + $0x2d9] ss:$0 sm:$0xff]  ;;  %v1525_v17 = vld [vmem:[#allocation2 + $0x2d7] ss:$0 sm:$0xff]  ;;  %s2138_s1 = smov 35  }
 0x3a8   :  { %v710_v19 = vmax.f32 %v630_v14, %v709_v15 }
 0x3aa   :  { %v711_v20 = vsub.f32 %v630_v14, %v710_v19  ;;  %v714_v21 = vsub.f32 %v709_v15, %v710_v19  ;;  %v1462_v14 = vand.u32 2147483647, %v1461_v13 }
 0x3ac   :  { %v712_v22 = vmul.f32 1.442695, %v711_v20  ;;  %v715_v23 = vmul.f32 1.442695, %v714_v21  ;;  %v1464_v15 = vsel %vm1463_vm5, %v1462_v14, 0.0 }
 0x3ad   :  { %1465 = vadd.xlane.f32.xlu0 %v1464_v15 }
 0x3ae   :  { %2067 = vpow2.f32 %v712_v22 }
 0x3af   :  { %2069 = vpow2.f32 %v715_v23 }
 0x3b8   :  { %v2068_v24 = vpop.eup %2067 }
 0x3b9   :  { %v2070_v25 = vpop.eup %2069 }
 0x3ba   :  { %v717_v26 = vadd.f32 %v2070_v25, %v2068_v24 }
 0x3bc   :  { %2071 = vrcp.f32 %v717_v26  ;;  %v1227_v26 = vld [vmem:[#allocation2 + $0x228] sm:$0xff] }
 0x3c6   :  { %v2072_v27 = vpop.eup %2071 }
 0x3c7   :  { %v720_v28 = vmul.f32 %v2072_v27, %v2070_v25  ;;  %v719_v30 = vmul.f32 %v2072_v27, %v2068_v24  ;;  %v1226_v25 = vld [vmem:[#allocation2 + $0x220] sm:$0xff] }
 0x3c9   :  { %1809 = vmatmul.mubr.msk.f32.vlgmr.msra.gmra.mrb[8].mxu0 %vm723_vm3, %v720_v28 }
 0x3ca   :  { %1812 = vmatpush3.msk.msra.mxu0 %vm727_vm2, %v721_v29  ;;  %1813 = vmatprep.mubr.msk.f32.mxu0 %vm2135_vm0, %v2136_v1 }
 0x3cb   :  { %2013 = vmatprep.subr.bf16.mxu0 %v2134_v0 }
 0x3d1   :  { %1814 = vmatmul.mubr.msk.f32.vlgmr.msra.gmra.mrb[8].mxu0 %vm723_vm3, %v719_v30 }
 0x3d2   :  { %1843 = vmatprep.mubr.msk.f32.mxu0 %vm2135_vm0, %v2136_v1  ;;  %2015 = vmatpush3.bf16.msra.mxu0 %v2014_v33  ;;  %v1229_v33 = vld [vmem:[#allocation2 + $0x238] sm:$0xff] }
 0x3d3   :  { %2016 = vmatprep.subr.bf16.mxu0 %v2134_v0  ;;  %v2047_v35 = vpack.c.bf16 %v1229_v33, %v1228_v32 }
 0x4a4   :  { %v873_v38 = vpop.f32.mrb[8].mxu0 }
 0x4a5   :  { %v877_v40 = vmul.f32 %v873_v38, %v545_v37  ;;  %v1815_v41 = vpop.f32.mrb[9].mxu0 }
 0x4a7   :  { %1833 = vmatmul.mubr.msk.f32.vlgmr.msra.gmra.mrb[8].mxu1 %vm43_vm1, %v877_v40 }
 0x4a8   :  { %2033 = vmatpush3.bf16.msra.mxu1 %v2032_v39  ;;  %1881 = vmatprep.mubr.msk.f32.mxu1 %vm2135_vm0, %v2136_v1  ;;  %v1466_v39 = vpop.xlane.xlu0 %1465 }
 0x4a9   :  { %2034 = vmatprep.subr.bf16.mxu1 %v2134_v0  ;;  %v1467_v40 = vmax.f32 %v1466_v39, 1e-12 }
 0x4ac   :  { %2036 = vmatpush3.bf16.msra.mxu1 %v2035_v44 }
 0x4ad   :  { %2037 = vmatprep.subr.bf16.mxu1 %v2134_v0 }
 0x4b0   :  { %2039 = vmatpush3.bf16.msra.mxu1 %v2038_v47 }
 0x4b1   :  { %2040 = vmatprep.subr.bf16.mxu1 %v2134_v0 }
 0x4b4   :  { %2042 = vmatpush3.bf16.msra.mxu1 %v2041_v50 }
 0x4b5   :  { %1895 = vmatprep.subr.mxu1 %v2136_v1 }
 0x4b7   :  { %1882 = vmatmul.mubr.msk.f32.vlgmr.msra.gmra.mrb[10].mxu1 %vm43_vm1, %v2211_v18  ;;  %v2017_v18 = vpack.c.bf16 %v967_v54, %v966_v53  ;;  %v1527_v53 = vld [vmem:[#allocation2 + $0x2d8] ss:$0 sm:$0xff] }
 0x4b8   :  { %1896 = vmatpush3.msk.msra.mxu1 %vm727_vm2, %v1314_v51  ;;  %1897 = vmatprep.mubr.msk.f32.mxu1 %vm2135_vm0, %v2136_v1 }
 0x4b9   :  { %1900 = vmatprep.subr.mxu1 %v2136_v1  ;;  %2018 = vmatpush3.bf16.msra.mxu0 %v2017_v18 }
 0x4ba   :  { %2019 = vmatprep.subr.bf16.mxu0 %v2134_v0 }
 0x4bb   :  { %1898 = vmatmul.mubr.msk.f32.vlgmr.msra.gmra.mrb[12].mxu1 %vm723_vm3, %v720_v28 }
 0x4bc   :  { %1901 = vmatpush3.msk.msra.mxu1 %vm727_vm2, %v1313_v52  ;;  %1902 = vmatprep.mubr.msk.f32.mxu1 %vm2135_vm0, %v2136_v1 }
 0x4c3   :  { %1903 = vmatmul.mubr.msk.f32.vlgmr.msra.gmra.mrb[12].mxu1 %vm723_vm3, %v719_v30  ;;  %v2044_v30 = vpack.c.bf16 %v1227_v26, %v1226_v25 }
 0x57a   :  { %v960_v56 = vpop.f32.mrb[8].mxu1 }
 0x57b   :  { %v961_v57 = vadd.f32 %v1523_v55, %v960_v56  ;;  %v1834_v58 = vpop.f32.mrb[9].mxu1 }
 0x57d   :  { %1844 = vmatmul.mubr.msk.f32.vlgmr.msra.gmra.mrb[10].mxu0 %vm973_vm4, %v961_v57 }
 0x57e   :  { %1862 = vmatprep.mubr.msk.f32.mxu0 %vm2135_vm0, %v2136_v1  ;;  %2021 = vmatpush3.bf16.msra.mxu0 %v2020_v3 }
 0x57f   :  { %2022 = vmatprep.subr.bf16.mxu0 %v2134_v0 }
 0x582   :  { %2024 = vmatpush3.bf16.msra.mxu0 %v2023_v6 }
 0x583   :  { %2025 = vmatprep.subr.bf16.mxu0 %v2134_v0 }
 0x586   :  { %2027 = vmatpush3.bf16.msra.mxu0 %v2026_v9 }
 0x587   :  { %2028 = vmatprep.subr.bf16.mxu0 %v2134_v0 }
 0x58a   :  { %v1217_v59 = vpop.f32.mrb[10].mxu1  ;;  %2030 = vmatpush3.bf16.msra.mxu0 %v2029_v12 }
 0x58b   :  { %v1883_v60 = vpop.f32.mrb[11].mxu1  ;;  %2043 = vmatprep.subr.bf16.mxu0 %v2134_v0  ;;  %v1218_v20 = vadd.f32 %v1529_v16, %v1217_v59 }
 0x58d   :  { %v1222_v24 = vmul.f32 0.70710677, %v1218_v20  ;;  %v1221_v37 = vmul.f32 0.5, %v1218_v20 }
 0x596   :  { %v1457_v61 = vpop.f32.mrb[12].mxu1 }
 0x597   :  { %1475 = vrot.lane.b32.xlu1 %v1457_v61, %s2137_s0  ;;  %v1904_v62 = vpop.f32.mrb[13].mxu1 }
 0x609   :  { %v1476_v52 = vpop.permute.xlu1 %1475 }
 0x650   :  { %v1043_v19 = vpop.f32.mrb[10].mxu0 }
 0x651   :  { %v1044_v21 = vadd.f32 %v1525_v17, %v1043_v19  ;;  %v1845_v22 = vpop.f32.mrb[11].mxu0 }
 0x653   :  { %v1048_v23 = vmul.f32 0.70710677, %v1044_v21  ;;  %v1047_v28 = vmul.f32 0.5, %v1044_v21 }
 0x655   :  { %2073 = verf.f32 %v1048_v23 }
 0x656   :  { %2075 = verf.f32 %v1222_v24 }
 0x657   :  { %2077 = vrcp.f32 %v1467_v40 }
 0x65f   :  { %v2074_v27 = vpop.eup %2073 }
 0x660   :  { %v1050_v29 = vadd.f32 1.0, %v2074_v27  ;;  %v2076_v34 = vpop.eup %2075 }
 0x661   :  { %v1224_v36 = vadd.f32 1.0, %v2076_v34  ;;  %v2078_v41 = vpop.eup %2077 }
 0x662   :  { %v1051_v31 = vmul.f32 %v1050_v29, %v1047_v28  ;;  %v1469_v42 = vmul.f32 %v2078_v41, %v1461_v13 }
 0x663   :  { %v1225_v38 = vmul.f32 %v1224_v36, %v1221_v37 }
 0x664   :  { %1863 = vmatmul.mubr.msk.f32.vlgmr.msra.gmra.mrb[12].mxu0 %vm43_vm1, %v1051_v31  ;;  %1479 = vrot.lane.b32.xlu1 %v1469_v42, %s2138_s1 }
 0x665   :  { %2045 = vmatpush3.bf16.msra.mxu0 %v2044_v30  ;;  %1892 = vmatprep.mubr.msk.f32.mxu0 %vm2135_vm0, %v2136_v1 }
 0x666   :  { %2046 = vmatprep.subr.bf16.mxu0 %v2134_v0 }
 0x669   :  { %2048 = vmatpush3.bf16.msra.mxu0 %v2047_v35 }
 0x66c   :  { %1893 = vmatmul.mubr.msk.f32.vlgmr.msra.gmra.mrb[14].mxu0 %vm973_vm4, %v1225_v38 }
 0x6d6   :  { %v1480_v55 = vpop.permute.xlu1 %1479 }
 0x737   :  { %v1134_v43 = vpop.f32.mrb[12].mxu0 }
 0x738   :  { %v1864_v44 = vpop.f32.mrb[13].mxu0  ;;  %v1135_v54 = vadd.f32 %v1527_v53, %v1134_v43 }
 0x73f   :  { %v1304_v46 = vpop.f32.mrb[14].mxu0 }
 0x740   :  { %v1305_v1 = vadd.f32 %v1531_v45, %v1304_v46  ;;  %v1894_v47 = vpop.f32.mrb[15].mxu0 }
 0x742   :  { %v1308_v48 = vsub.f32 0.0, %v1305_v1 }
 0x744   :  { %v1309_v0 = vmul.f32 1.442695, %v1308_v48 }
 0x746   :  { %2079 = vpow2.f32 %v1309_v0 }
 0x750   :  { %v2080_v49 = vpop.eup %2079 }
 0x751   :  { %v1311_v50 = vadd.f32 1.0, %v2080_v49 }
 0x753   :  { %2081 = vrcp.f32 %v1311_v50 }
 0x75d   :  { %v2082_v51 = vpop.eup %2081 }
 0x75e   :  { %1471 = vrot.lane.b32.xlu0 %v2082_v51, %s2139_s29 }
 0x7d0   :  { %v1472_v18 = vpop.permute.xlu0 %1471 }
 0x7d1   :  { %v1482_v56 = vsel %vm973_vm4, %v1135_v54, %v1472_v18 }
 0x7d2   :  { %v1484_v57 = vsel %vm1483_vm6, %v1482_v56, %v1476_v52 }
 0x7d3   :  { %v1486_v58 = vsel %vm1485_vm7, %v1484_v57, %v1480_v55 }
 0x7d4   :  { %v1488_v59 = vsel %vm1487_vm8, %v1486_v58, 0.0 }
 0x7d5   :  { %1489 = vst [vmem:[#allocation5] sm:$0xff] %v1488_v59 }
 0x7d6   :  { %2116 = shalt.err (!%p2113_p12)
}
 0x7d7   :  { %s2117_s8 = scalar_lea.hbm %s2308_s3, 128 }
 0x7d8   :  { %p2118_p13 = scmp.ne.s32.totalorder %s2308_s3, %s2117_s8  ;;  %p2121_p0 = scmp.lt.u32.totalorder %s2117_s8, %s2308_s3 }
 0x7da   :  { %p2123_p1 = pnand %p2121_p0, %p2118_p13 }
 0x7dc   :  { %2126 = shalt.err (!%p2123_p1)
}
 0x7dd   :  { %1499 = dma.vmem_to_hbm [thread:$0]  %s1497_s4, 128, %s2308_s3, [#allocation4]  }
 0x7de   :  { %2129 = dma.done.wait [#allocation4], 128  }
 0x7df   :  { %2130 = vsyncadd [#allocation4], 4294967168 }
 0x7e0   :  { %1503 = vsyncpa [#allocation3], 1 }
 0x7e1   :  { %1504 = vsyncpa [#allocation4], 1 }

</bundles_post_ra>
